<compile_context>
chip_gen: v7x
topology: tpu7x:2x2x1
jax: 0.10.0
libtpu: 0.0.40
codegen_flags: <defaults>
</compile_context>

<pallas_src>
import jax
import jax.numpy as jnp
from jax.experimental import pallas as pl
from jax.experimental.pallas import tpu as pltpu

H, W = 64, 3           # spatial height (-> Linear(64,...)) and width (-> Conv2d(3,1))
D = H * W              # 192: flattened spatial size, row-major index = h*3 + w
NOUT = 128             # lane-dense fused output width: [feat(64) | y(2) | zero-pad(62)]
NEG_SLOPE = 0.01       # nn.LeakyReLU default
EPS = 1e-5             # nn.BatchNorm2d default


def feature_agg_kernel(x_ref, w1_ref, b1_ref, w2_ref, b2_ref, w3_ref, b3_ref,
                       wlin_ref, blin_ref, out_ref):
    """One grid step == TB batch samples; all heavy math on the MXU.

    x_ref   : (TB, 192) VMEM   flattened input, x_flat[b, h*3+w] = x[b,0,h,w]
    w1/w2   : (192,192) VMEM   BN-folded 3x3 convs as Toeplitz matrices
    b1/b2   : (1, 192)  VMEM   BN-folded biases (broadcast over spatial)
    w3      : (192, 64) VMEM   BN-folded transpose(1,3)+Conv2d(3,1,1)
    b3      : (1, 64)   VMEM
    wlin    : (64, 128) VMEM   [feature.weight^T | feature.weight^T @ FC.weight^T | 0]
    blin    : (1, 128)  VMEM   [feature.bias | feature.bias @ FC.weight^T + FC.bias | 0]
    out_ref : (TB, 128) VMEM   [feat | y | 0]
    """
    def lrelu(z):
        return jnp.where(z >= 0, z, NEG_SLOPE * z)

    x = x_ref[...]
    z = lrelu(jnp.dot(x, w1_ref[...], preferred_element_type=jnp.float32) + b1_ref[...])
    z = lrelu(jnp.dot(z, w2_ref[...], preferred_element_type=jnp.float32) + b2_ref[...])
    v = lrelu(jnp.dot(z, w3_ref[...], preferred_element_type=jnp.float32) + b3_ref[...])
    out_ref[...] = (jnp.dot(v, wlin_ref[...], preferred_element_type=jnp.float32)
                    + blin_ref[...])


def _conv3x3_to_matrix(k):
    """(3,3) cross-correlation kernel, padding=1, on a (64,3) grid -> (192,192) M
    such that out_flat = x_flat @ M  (flat index = h*3 + w; zeros encode padding)."""
    M = jnp.zeros((D, D), dtype=jnp.float32)
    for i in range(3):           # kernel H offset; src h = dst h + (i-1)
        for j in range(3):       # kernel W offset; src w = dst w + (j-1)
            dh, dw = i - 1, j - 1
            h0, h1 = max(0, -dh), min(H, H - dh)
            w0, w1 = max(0, -dw), min(W, W - dw)
            hh, ww = jnp.meshgrid(jnp.arange(h0, h1), jnp.arange(w0, w1), indexing='ij')
            dst = (hh * W + ww).reshape(-1)
            src = ((hh + dh) * W + (ww + dw)).reshape(-1)
            M = M.at[src, dst].add(k[i, j])
    return M


def _conv1x1_to_matrix(w3):
    """transpose(1,3) + Conv2d(3,1,1):  v[:, h] = sum_w w3[w] * z_flat[:, h*3+w]."""
    M = jnp.zeros((D, H), dtype=jnp.float32)
    h = jnp.arange(H)
    for w in range(W):
        M = M.at[h * W + w, h].set(w3[w])
    return M


def feature_aggregator1(x_nchw, p, tb_max=512):
    """x_nchw: (B, 1, 64, 3) float32. Returns (feat (B,64), y (B,2))."""
    B = x_nchw.shape[0]

    def rup(n, m):
        return ((n + m - 1) // m) * m

    # Tile selection: minimize padding, >=2 steps when the batch allows so the
    # "parallel" axis can shard across both TensorCores on v7x.
    steps = max(pl.cdiv(B, tb_max), 1)
    if steps == 1 and B >= 16:
        steps = 2
    TB = rup(pl.cdiv(B, steps), 8)
    Bpad = steps * TB

    # (B, 1, 64, 3) -> (B, 192): pure row-major reshape (no relayout pass).
    x_flat = jnp.reshape(x_nchw, (B, D)).astype(jnp.float32)
    if Bpad != B:
        x_flat = jnp.pad(x_flat, ((0, Bpad - B), (0, 0)))

    def fold(w, b, g, beta, m, v):
        # eval-mode BN folded into conv: a*(conv(x)+b - m) + beta
        a = g[0] / jnp.sqrt(v[0] + EPS)
        return w * a, a * (b[0] - m[0]) + beta[0]

    w1, b1 = fold(p['conv1_w'][0, 0], p['conv1_b'], p['bn1_g'], p['bn1_b'], p['bn1_m'], p['bn1_v'])
    w2, b2 = fold(p['conv2_w'][0, 0], p['conv2_b'], p['bn2_g'], p['bn2_b'], p['bn2_m'], p['bn2_v'])
    w3, b3 = fold(p['conv3_w'][0, :, 0, 0], p['conv3_b'], p['bn3_g'], p['bn3_b'], p['bn3_m'], p['bn3_v'])

    W1m = _conv3x3_to_matrix(w1)                                  # (192, 192)
    W2m = _conv3x3_to_matrix(w2)                                  # (192, 192)
    W3m = _conv1x1_to_matrix(w3)                                  # (192, 64)
    b1v = jnp.broadcast_to(b1, (1, D)).astype(jnp.float32)
    b2v = jnp.broadcast_to(b2, (1, D)).astype(jnp.float32)
    b3v = jnp.broadcast_to(b3, (1, H)).astype(jnp.float32)

    # Fused final linears -> one lane-dense (64,128) weight; y does not serially
    # depend on feat's MXU result (FC folded through feature in the wrapper).
    wf_t = jnp.transpose(p['feat_w']).astype(jnp.float32)         # (64, 64)
    wfc_t = jnp.transpose(p['fc_w']).astype(jnp.float32)          # (64, 2)
    wy = jnp.dot(wf_t, wfc_t, precision=jax.lax.Precision.HIGHEST)            # (64, 2)
    by = (jnp.dot(p['feat_b'], wfc_t, precision=jax.lax.Precision.HIGHEST)
          + p['fc_b'])                                                          # (2,)
    wlin = (jnp.zeros((H, NOUT), jnp.float32)
            .at[:, :H].set(wf_t)
            .at[:, H:H + 2].set(wy))
    blin = (jnp.zeros((1, NOUT), jnp.float32)
            .at[0, :H].set(p['feat_b'].astype(jnp.float32))
            .at[0, H:H + 2].set(by.astype(jnp.float32)))

    flops = 2 * Bpad * (2 * D * D + D * H + H * NOUT)
    bytes_accessed = 4 * (Bpad * (D + NOUT)
                          + 2 * D * D + D * H + H * NOUT + 2 * D + H + NOUT)

    out = pl.pallas_call(
        feature_agg_kernel,
        out_shape=jax.ShapeDtypeStruct((Bpad, NOUT), jnp.float32),
        grid=(steps,),
        in_specs=[
            pl.BlockSpec((TB, D), lambda b: (b, 0)),       # x tile (TB samples)
            pl.BlockSpec((D, D), lambda b: (0, 0)),        # conv1 Toeplitz
            pl.BlockSpec((1, D), lambda b: (0, 0)),
            pl.BlockSpec((D, D), lambda b: (0, 0)),        # conv2 Toeplitz
            pl.BlockSpec((1, D), lambda b: (0, 0)),
            pl.BlockSpec((D, H), lambda b: (0, 0)),        # conv3 (3->1) matrix
            pl.BlockSpec((1, H), lambda b: (0, 0)),
            pl.BlockSpec((H, NOUT), lambda b: (0, 0)),     # fused linear weight
            pl.BlockSpec((1, NOUT), lambda b: (0, 0)),     # fused linear bias
        ],
        out_specs=pl.BlockSpec((TB, NOUT), lambda b: (b, 0)),   # dense (TB,128) slab
        compiler_params=pltpu.CompilerParams(dimension_semantics=("parallel",)),
        cost_estimate=pl.CostEstimate(flops=int(flops), transcendentals=0,
                                      bytes_accessed=int(bytes_accessed)),
    )(x_flat, W1m, b1v, W2m, b2v, W3m, b3v, wlin, blin)

    return out[:B, :H], out[:B, H:H + 2]


def reference(x_nchw, p):
    """Pure-JAX reference (eval-mode BN), mirrors the PyTorch forward."""
    def lrelu(z):
        return jnp.where(z >= 0, z, NEG_SLOPE * z)

    def bn(z, g, b, m, v):
        return (z - m[0]) / jnp.sqrt(v[0] + EPS) * g[0] + b[0]

    def conv(z, w, pad):
        return jax.lax.conv_general_dilated(z, w, (1, 1), pad,
                                            dimension_numbers=('NCHW', 'OIHW', 'NCHW'))

    x = conv(x_nchw, p['conv1_w'], 'SAME') + p['conv1_b'].reshape(1, 1, 1, 1)
    x = lrelu(bn(x, p['bn1_g'], p['bn1_b'], p['bn1_m'], p['bn1_v']))
    x = conv(x, p['conv2_w'], 'SAME') + p['conv2_b'].reshape(1, 1, 1, 1)
    x = lrelu(bn(x, p['bn2_g'], p['bn2_b'], p['bn2_m'], p['bn2_v']))
    x = jnp.transpose(x, (0, 3, 2, 1))                      # (B, 3, 64, 1)
    x = conv(x, p['conv3_w'], 'VALID') + p['conv3_b'].reshape(1, 1, 1, 1)
    x = lrelu(bn(x, p['bn3_g'], p['bn3_b'], p['bn3_m'], p['bn3_v']))
    x = x.reshape(x.shape[0], -1)                           # (B, 64)
    feat = x @ p['feat_w'].T + p['feat_b']
    y = feat @ p['fc_w'].T + p['fc_b']
    return feat, y


if __name__ == "__main__":
    keys = jax.random.split(jax.random.PRNGKey(42), 22)
    nrm = lambda k, s, sc: sc * jax.random.normal(k, s, jnp.float32)
    params = {
        'conv1_w': nrm(keys[0], (1, 1, 3, 3), 0.3),
        'conv1_b': nrm(keys[1], (1,), 0.1),
        'bn1_g': 1.0 + nrm(keys[2], (1,), 0.1),
        'bn1_b': nrm(keys[3], (1,), 0.05),
        'bn1_m': nrm(keys[4], (1,), 0.02),
        'bn1_v': 1.0 + 0.1 * jax.random.uniform(keys[5], (1,), jnp.float32),
        'conv2_w': nrm(keys[6], (1, 1, 3, 3), 0.3),
        'conv2_b': nrm(keys[7], (1,), 0.1),
        'bn2_g': 1.0 + nrm(keys[8], (1,), 0.1),
        'bn2_b': nrm(keys[9], (1,), 0.05),
        'bn2_m': nrm(keys[10], (1,), 0.02),
        'bn2_v': 1.0 + 0.1 * jax.random.uniform(keys[11], (1,), jnp.float32),
        'conv3_w': nrm(keys[12], (1, 3, 1, 1), 0.4),
        'conv3_b': nrm(keys[13], (1,), 0.1),
        'bn3_g': 1.0 + nrm(keys[14], (1,), 0.1),
        'bn3_b': nrm(keys[15], (1,), 0.05),
        'bn3_m': nrm(keys[16], (1,), 0.02),
        'bn3_v': 1.0 + 0.1 * jax.random.uniform(keys[17], (1,), jnp.float32),
        'feat_w': nrm(keys[18], (64, 64), 0.1),
        'feat_b': nrm(keys[19], (64,), 0.05),
        'fc_w': nrm(keys[20], (2, 64), 0.1),
        'fc_b': nrm(keys[21], (2,), 0.05),
    }

    # B=2 exercises the single-step path; B=24 exercises the multi-step
    # (2 grid steps + batch padding) path used on larger batches / v7x.
    for B in (2, 24):
        x = jax.random.normal(jax.random.PRNGKey(0), (B, 1, H, W), dtype=jnp.float32)
        feat, y = feature_aggregator1(x, params)
        jax.block_until_ready((feat, y))

        feat_ref, y_ref = reference(x, params)
        assert feat.shape == (B, 64) and y.shape == (B, 2)
        assert jnp.allclose(feat, feat_ref, atol=1e-4, rtol=1e-4)
        assert jnp.allclose(y, y_ref, atol=1e-4, rtol=1e-4)

    print("KERNEL_OK")
</pallas_src>

<mosaic_0001>
module attributes {stable_mosaic.version = 11 : i64} {
  func.func @feature_agg_kernel(%arg0: i32, %arg1: memref<8x192xf32, #tpu.memory_space<vmem>>, %arg2: memref<192x192xf32, #tpu.memory_space<vmem>>, %arg3: memref<1x192xf32, #tpu.memory_space<vmem>>, %arg4: memref<192x192xf32, #tpu.memory_space<vmem>>, %arg5: memref<1x192xf32, #tpu.memory_space<vmem>>, %arg6: memref<192x64xf32, #tpu.memory_space<vmem>>, %arg7: memref<1x64xf32, #tpu.memory_space<vmem>>, %arg8: memref<64x128xf32, #tpu.memory_space<vmem>>, %arg9: memref<1x128xf32, #tpu.memory_space<vmem>>, %arg10: memref<8x128xf32, #tpu.memory_space<vmem>>) attributes {dimension_semantics = [#tpu.dimension_semantics<parallel>], iteration_bounds = array<i64: 1>, scalar_prefetch = 0 : i64, scratch_operands = 0 : i64, tpu.core_type = #tpu.core_type<tc>, window_params = [{transform_indices = @transform_0, window_bounds = array<i64: 8, 192>}, {pipeline_mode = #tpu.pipeline_mode<synchronous>, transform_indices = @transform_1, window_bounds = array<i64: 192, 192>}, {pipeline_mode = #tpu.pipeline_mode<synchronous>, transform_indices = @transform_2, window_bounds = array<i64: 1, 192>}, {pipeline_mode = #tpu.pipeline_mode<synchronous>, transform_indices = @transform_3, window_bounds = array<i64: 192, 192>}, {pipeline_mode = #tpu.pipeline_mode<synchronous>, transform_indices = @transform_4, window_bounds = array<i64: 1, 192>}, {pipeline_mode = #tpu.pipeline_mode<synchronous>, transform_indices = @transform_5, window_bounds = array<i64: 192, 64>}, {pipeline_mode = #tpu.pipeline_mode<synchronous>, transform_indices = @transform_6, window_bounds = array<i64: 1, 64>}, {pipeline_mode = #tpu.pipeline_mode<synchronous>, transform_indices = @transform_7, window_bounds = array<i64: 64, 128>}, {pipeline_mode = #tpu.pipeline_mode<synchronous>, transform_indices = @transform_8, window_bounds = array<i64: 1, 128>}, {transform_indices = @transform_9, window_bounds = array<i64: 8, 128>}]} {
    %c0 = arith.constant 0 : index
    %c0_0 = arith.constant 0 : index
    %0 = vector.load %arg1[%c0, %c0_0] : memref<8x192xf32, #tpu.memory_space<vmem>>, vector<8x192xf32>
    %c0_1 = arith.constant 0 : index
    %c0_2 = arith.constant 0 : index
    %1 = vector.load %arg2[%c0_1, %c0_2] : memref<192x192xf32, #tpu.memory_space<vmem>>, vector<192x192xf32>
    %cst = arith.constant dense<0.000000e+00> : vector<8x192xf32>
    %2 = tpu.matmul %0, %1, %cst {dimension_numbers = #tpu.dot_dimension_numbers<[1], [0], [0], [1], [0, 0, 1, 1], [], []>} : vector<8x192xf32>, vector<192x192xf32>, vector<8x192xf32> -> vector<8x192xf32>
    %c0_3 = arith.constant 0 : index
    %c0_4 = arith.constant 0 : index
    %3 = vector.load %arg3[%c0_3, %c0_4] : memref<1x192xf32, #tpu.memory_space<vmem>>, vector<1x192xf32>
    %4 = vector.broadcast %3 : vector<1x192xf32> to vector<8x192xf32>
    %5 = arith.addf %2, %4 : vector<8x192xf32>
    %cst_5 = arith.constant 0.000000e+00 : f32
    %6 = vector.broadcast %cst_5 : f32 to vector<8x192xf32>
    %7 = arith.cmpf oge, %5, %6 : vector<8x192xf32>
    %cst_6 = arith.constant 0.00999999977 : f32
    %8 = vector.broadcast %cst_6 : f32 to vector<8x192xf32>
    %9 = arith.mulf %8, %5 : vector<8x192xf32>
    %10 = arith.select %7, %5, %9 : vector<8x192xi1>, vector<8x192xf32>
    %c0_7 = arith.constant 0 : index
    %c0_8 = arith.constant 0 : index
    %11 = vector.load %arg4[%c0_7, %c0_8] : memref<192x192xf32, #tpu.memory_space<vmem>>, vector<192x192xf32>
    %cst_9 = arith.constant dense<0.000000e+00> : vector<8x192xf32>
    %12 = tpu.matmul %10, %11, %cst_9 {dimension_numbers = #tpu.dot_dimension_numbers<[1], [0], [0], [1], [0, 0, 1, 1], [], []>} : vector<8x192xf32>, vector<192x192xf32>, vector<8x192xf32> -> vector<8x192xf32>
    %c0_10 = arith.constant 0 : index
    %c0_11 = arith.constant 0 : index
    %13 = vector.load %arg5[%c0_10, %c0_11] : memref<1x192xf32, #tpu.memory_space<vmem>>, vector<1x192xf32>
    %14 = vector.broadcast %13 : vector<1x192xf32> to vector<8x192xf32>
    %15 = arith.addf %12, %14 : vector<8x192xf32>
    %cst_12 = arith.constant 0.000000e+00 : f32
    %16 = vector.broadcast %cst_12 : f32 to vector<8x192xf32>
    %17 = arith.cmpf oge, %15, %16 : vector<8x192xf32>
    %cst_13 = arith.constant 0.00999999977 : f32
    %18 = vector.broadcast %cst_13 : f32 to vector<8x192xf32>
    %19 = arith.mulf %18, %15 : vector<8x192xf32>
    %20 = arith.select %17, %15, %19 : vector<8x192xi1>, vector<8x192xf32>
    %c0_14 = arith.constant 0 : index
    %c0_15 = arith.constant 0 : index
    %21 = vector.load %arg6[%c0_14, %c0_15] : memref<192x64xf32, #tpu.memory_space<vmem>>, vector<192x64xf32>
    %cst_16 = arith.constant dense<0.000000e+00> : vector<8x64xf32>
    %22 = tpu.matmul %20, %21, %cst_16 {dimension_numbers = #tpu.dot_dimension_numbers<[1], [0], [0], [1], [0, 0, 1, 1], [], []>} : vector<8x192xf32>, vector<192x64xf32>, vector<8x64xf32> -> vector<8x64xf32>
    %c0_17 = arith.constant 0 : index
    %c0_18 = arith.constant 0 : index
    %23 = vector.load %arg7[%c0_17, %c0_18] : memref<1x64xf32, #tpu.memory_space<vmem>>, vector<1x64xf32>
    %24 = vector.broadcast %23 : vector<1x64xf32> to vector<8x64xf32>
    %25 = arith.addf %22, %24 : vector<8x64xf32>
    %cst_19 = arith.constant 0.000000e+00 : f32
    %26 = vector.broadcast %cst_19 : f32 to vector<8x64xf32>
    %27 = arith.cmpf oge, %25, %26 : vector<8x64xf32>
    %cst_20 = arith.constant 0.00999999977 : f32
    %28 = vector.broadcast %cst_20 : f32 to vector<8x64xf32>
    %29 = arith.mulf %28, %25 : vector<8x64xf32>
    %30 = arith.select %27, %25, %29 : vector<8x64xi1>, vector<8x64xf32>
    %c0_21 = arith.constant 0 : index
    %c0_22 = arith.constant 0 : index
    %31 = vector.load %arg8[%c0_21, %c0_22] : memref<64x128xf32, #tpu.memory_space<vmem>>, vector<64x128xf32>
    %cst_23 = arith.constant dense<0.000000e+00> : vector<8x128xf32>
    %32 = tpu.matmul %30, %31, %cst_23 {dimension_numbers = #tpu.dot_dimension_numbers<[1], [0], [0], [1], [0, 0, 1, 1], [], []>} : vector<8x64xf32>, vector<64x128xf32>, vector<8x128xf32> -> vector<8x128xf32>
    %c0_24 = arith.constant 0 : index
    %c0_25 = arith.constant 0 : index
    %33 = vector.load %arg9[%c0_24, %c0_25] : memref<1x128xf32, #tpu.memory_space<vmem>>, vector<1x128xf32>
    %34 = vector.broadcast %33 : vector<1x128xf32> to vector<8x128xf32>
    %35 = arith.addf %32, %34 : vector<8x128xf32>
    %c0_26 = arith.constant 0 : index
    %c0_27 = arith.constant 0 : index
    %36 = vector.load %arg10[%c0_26, %c0_27] : memref<8x128xf32, #tpu.memory_space<vmem>>, vector<8x128xf32>
    tpu.vector_store %arg10[%c0_26, %c0_27], %35 {strides = array<i32>} : memref<8x128xf32, #tpu.memory_space<vmem>>, vector<8x128xf32>,
    return
  }
  func.func @transform_0(%arg0: i32) -> (i32, i32) {
    %c0_i32 = arith.constant 0 : i32
    %c0_i32_0 = arith.constant 0 : i32
    return %arg0, %c0_i32 : i32, i32
  }
  func.func @transform_1(%arg0: i32) -> (i32, i32) {
    %c0_i32 = arith.constant 0 : i32
    %c0_i32_0 = arith.constant 0 : i32
    %c0_i32_1 = arith.constant 0 : i32
    return %c0_i32, %c0_i32_0 : i32, i32
  }
  func.func @transform_2(%arg0: i32) -> (i32, i32) {
    %c0_i32 = arith.constant 0 : i32
    %c0_i32_0 = arith.constant 0 : i32
    %c0_i32_1 = arith.constant 0 : i32
    return %c0_i32, %c0_i32_0 : i32, i32
  }
  func.func @transform_3(%arg0: i32) -> (i32, i32) {
    %c0_i32 = arith.constant 0 : i32
    %c0_i32_0 = arith.constant 0 : i32
    %c0_i32_1 = arith.constant 0 : i32
    return %c0_i32, %c0_i32_0 : i32, i32
  }
  func.func @transform_4(%arg0: i32) -> (i32, i32) {
    %c0_i32 = arith.constant 0 : i32
    %c0_i32_0 = arith.constant 0 : i32
    %c0_i32_1 = arith.constant 0 : i32
    return %c0_i32, %c0_i32_0 : i32, i32
  }
  func.func @transform_5(%arg0: i32) -> (i32, i32) {
    %c0_i32 = arith.constant 0 : i32
    %c0_i32_0 = arith.constant 0 : i32
    %c0_i32_1 = arith.constant 0 : i32
    return %c0_i32, %c0_i32_0 : i32, i32
  }
  func.func @transform_6(%arg0: i32) -> (i32, i32) {
    %c0_i32 = arith.constant 0 : i32
    %c0_i32_0 = arith.constant 0 : i32
    %c0_i32_1 = arith.constant 0 : i32
    return %c0_i32, %c0_i32_0 : i32, i32
  }
  func.func @transform_7(%arg0: i32) -> (i32, i32) {
    %c0_i32 = arith.constant 0 : i32
    %c0_i32_0 = arith.constant 0 : i32
    %c0_i32_1 = arith.constant 0 : i32
    return %c0_i32, %c0_i32_0 : i32, i32
  }
  func.func @transform_8(%arg0: i32) -> (i32, i32) {
    %c0_i32 = arith.constant 0 : i32
    %c0_i32_0 = arith.constant 0 : i32
    %c0_i32_1 = arith.constant 0 : i32
    return %c0_i32, %c0_i32_0 : i32, i32
  }
  func.func @transform_9(%arg0: i32) -> (i32, i32) {
    %c0_i32 = arith.constant 0 : i32
    %c0_i32_0 = arith.constant 0 : i32
    return %arg0, %c0_i32 : i32, i32
  }
}

</mosaic_0001>

<bundles_post_ra>
// kernel: tpu_custom_call.1
= control target key start
LH: loop header
LB: loop body
LE: loop exit
PB: predicated region body
PF: predicated region fallthrough
CT: control target
= control target key end

     0   :  { %14 = vsyncpa [#allocation3], 0  ;;  %s1042_s0 = inlined_call_operand.vmem [shape: f32[8,192], index: 0, kind: input, shape index: {}]   ;;  %s1043_s1 = inlined_call_operand.hbm [shape: f32[192,192], index: 1, kind: input, shape index: {}]   ;;  %s1044_s2 = inlined_call_operand.vmem [shape: f32[1,192], index: 2, kind: input, shape index: {}]   ;;  %s1045_s3 = inlined_call_operand.hbm [shape: f32[192,192], index: 3, kind: input, shape index: {}]   ;;  %s1046_s4 = inlined_call_operand.vmem [shape: f32[1,192], index: 4, kind: input, shape index: {}]   ;;  %s1047_s5 = inlined_call_operand.vmem [shape: f32[192,64], index: 5, kind: input, shape index: {}]   ;;  %s1048_s6 = inlined_call_operand.vmem [shape: f32[1,64], index: 6, kind: input, shape index: {}]   ;;  %s1049_s7 = inlined_call_operand.vmem [shape: f32[64,128], index: 7, kind: input, shape index: {}]   ;;  %s1050_s8 = inlined_call_operand.vmem [shape: f32[1,128], index: 8, kind: input, shape index: {}]   ;;  %s1051_s9 = inlined_call_operand.hbm [shape: f32[8,128], index: 9, kind: output, shape index: {}]  }
   0x1   :  { %15 = vsyncpa [#allocation6], 0 }
   0x2   :  { %16 = vsyncpa [#allocation4], 0  ;;  %s814_s30 = smov [#allocation2]   ;;  %s742_s13 = scalar_lea.hbm %s1043_s1, 6144 }
   0x3   :  { %s24_s10 = sshll.u32 %s814_s30, 4  ;;  %p743_p0 = scmp.ne.s32.totalorder %s1043_s1, %s742_s13  ;;  %s25_s10 = int_to_ptr.vmem [resolvable:$true] %s24_s10 }
   0x4   :  { %p746_p1 = scmp.lt.u32.totalorder %s742_s13, %s1043_s1 }
   0x6   :  { %p748_p2 = pnand %p746_p1, %p743_p0 }
   0x8   :  { %751 = shalt.err (!%p748_p2)
}
   0x9   :  { %s752_s18 = scalar_lea.vmem %s25_s10, 6144  ;;  %p757_p4 = scmp.lt.s32.totalorder %s25_s10, %s25_s10 }
   0xa   :  { %p753_p3 = scmp.ne.s32.totalorder %s25_s10, %s752_s18  ;;  %p758_p5 = scmp.lt.s32.totalorder %s752_s18, %s752_s18 }
   0xc   :  { %p759_p6 = por %p758_p5, %p757_p4 }
   0xe   :  { %p760_p7 = pnand %p759_p6, %p753_p3 }
  0x10   :  { %763 = shalt.err (!%p760_p7)
}
  0x11   :  { %s815_s19 = smov 256   ;;  %s816_s20 = smov 16  }
  0x12   :  { %30 = dma.hbm_to_vmem [thread:$0]  %s1043_s1, 6144, %s25_s10, [#allocation3], %s815_s19, %s815_s19, %s816_s20  }
  0x13   :  { %s817_s23 = smov [#allocation5]   ;;  %s764_s27 = scalar_lea.hbm %s1045_s3, 6144 }
  0x14   :  { %s38_s24 = sshll.u32 %s817_s23, 4  ;;  %p765_p8 = scmp.ne.s32.totalorder %s1045_s3, %s764_s27  ;;  %s39_s24 = int_to_ptr.vmem [resolvable:$true] %s38_s24 }
  0x15   :  { %p768_p9 = scmp.lt.u32.totalorder %s764_s27, %s1045_s3 }
  0x17   :  { %p770_p10 = pnand %p768_p9, %p765_p8 }
  0x19   :  { %773 = shalt.err (!%p770_p10)
}
  0x1a   :  { %s774_s12 = scalar_lea.vmem %s39_s24, 6144  ;;  %p779_p12 = scmp.lt.s32.totalorder %s39_s24, %s39_s24 }
  0x1b   :  { %p775_p11 = scmp.ne.s32.totalorder %s39_s24, %s774_s12  ;;  %p780_p13 = scmp.lt.s32.totalorder %s774_s12, %s774_s12 }
  0x1d   :  { %p781_p0 = por %p780_p13, %p779_p12 }
  0x1f   :  { %p782_p1 = pnand %p781_p0, %p775_p11 }
  0x21   :  { %785 = shalt.err (!%p782_p1)
}
  0x22   :  { %44 = dma.hbm_to_vmem [thread:$0]  %s1045_s3, 6144, %s39_s24, [#allocation6], %s815_s19, %s815_s19, %s816_s20  }
  0x23   :  { %808 = dma.done.wait [#allocation3], 6144  }
  0x24   :  { %809 = vsyncadd [#allocation3], 4294961152 }
  0x25   :  { %810 = dma.done.wait [#allocation6], 6144  }
  0x26   :  { %811 = vsyncadd [#allocation6], 4294961152  ;;  %v64_v0 = vld [vmem:[#allocation2 + $0x8] sm:$0xff]  ;;  %v66_v1 = vld [vmem:[#allocation2 + $0x18] sm:$0xff]  ;;  %vm123_vm0 = vcmask 523264   ;;  %vm819_vm5 = vmmov 0  }
  0x27   :  { %v63_v2 = vld [vmem:[#allocation2] sm:$0xff]  ;;  %v590_v3 = vpack.c.bf16 %v66_v1, %v64_v0  ;;  %v65_v4 = vld [vmem:[#allocation2 + $0x10] sm:$0xff]  ;;  %v68_v5 = vld [vmem:[#allocation2 + $0x28] sm:$0xff] }
  0x28   :  { %v70_v6 = vld [vmem:[#allocation2 + $0x38] sm:$0xff]  ;;  %v592_v7 = vpack.c.bf16 %v65_v4, %v63_v2  ;;  %v67_v9 = vld [vmem:[#allocation2 + $0x20] sm:$0xff]  ;;  %v69_v10 = vld [vmem:[#allocation2 + $0x30] sm:$0xff] }
  0x29   :  { %v594_v8 = vpack.c.bf16 %v70_v6, %v68_v5  ;;  %v72_v11 = vld [vmem:[#allocation2 + $0x48] sm:$0xff]  ;;  %591 = vmatprep.subr.bf16.mxu0 %v590_v3  ;;  %v74_v12 = vld [vmem:[#allocation2 + $0x58] sm:$0xff]  ;;  %v596_v13 = vpack.c.bf16 %v69_v10, %v67_v9  ;;  %v71_v15 = vld [vmem:[#allocation2 + $0x40] sm:$0xff] }
  0x2a   :  { %593 = vmatpush1.bf16.msra.mxu0 %v592_v7  ;;  %v598_v14 = vpack.c.bf16 %v74_v12, %v72_v11  ;;  %v73_v16 = vld [vmem:[#allocation2 + $0x50] sm:$0xff]  ;;  %v76_v17 = vld [vmem:[#allocation2 + $0x68] sm:$0xff]  ;;  %v78_v18 = vld [vmem:[#allocation2 + $0x78] sm:$0xff] }
  0x2b   :  { %595 = vmatprep.subr.bf16.mxu0 %v594_v8  ;;  %v600_v19 = vpack.c.bf16 %v73_v16, %v71_v15  ;;  %v602_v20 = vpack.c.bf16 %v78_v18, %v76_v17  ;;  %v75_v21 = vld [vmem:[#allocation2 + $0x60] sm:$0xff]  ;;  %v77_v22 = vld [vmem:[#allocation2 + $0x70] sm:$0xff]  ;;  %v80_v23 = vld [vmem:[#allocation2 + $0x88] sm:$0xff] }
  0x2c   :  { %v82_v24 = vld [vmem:[#allocation2 + $0x98] sm:$0xff]  ;;  %v604_v25 = vpack.c.bf16 %v77_v22, %v75_v21  ;;  %v79_v27 = vld [vmem:[#allocation2 + $0x80] sm:$0xff]  ;;  %v81_v28 = vld [vmem:[#allocation2 + $0x90] sm:$0xff] }
  0x2d   :  { %v606_v26 = vpack.c.bf16 %v82_v24, %v80_v23  ;;  %v84_v29 = vld [vmem:[#allocation2 + $0xa8] sm:$0xff]  ;;  %v86_v30 = vld [vmem:[#allocation2 + $0xb8] sm:$0xff]  ;;  %v83_v31 = vld [vmem:[#allocation2 + $0xa0] sm:$0xff]  ;;  %v608_v33 = vpack.c.bf16 %v81_v28, %v79_v27 }
  0x2e   :  { %597 = vmatpush1.bf16.msra.mxu0 %v596_v13  ;;  %v85_v32 = vld [vmem:[#allocation2 + $0xb0] sm:$0xff]  ;;  %v88_v34 = vld [vmem:[#allocation2 + $0xc8] sm:$0xff]  ;;  %v90_v35 = vld [vmem:[#allocation2 + $0xd8] sm:$0xff]  ;;  %v610_v38 = vpack.c.bf16 %v86_v30, %v84_v29 }
  0x2f   :  { %599 = vmatprep.subr.bf16.mxu0 %v598_v14  ;;  %v62_v36 = vld [vmem:[%s1042_s0 + $0x8] sm:$0xff]  ;;  %v207_v39 = vld [vmem:[#allocation5 + $0x18] sm:$0xff]  ;;  %v204_v40 = vld [vmem:[#allocation5] sm:$0xff]  ;;  %v612_v51 = vpack.c.bf16 %v85_v32, %v83_v31  ;;  %v614_v52 = vpack.c.bf16 %v90_v35, %v88_v34 }
  0x30   :  { %v205_v37 = vld [vmem:[#allocation5 + $0x8] sm:$0xff]  ;;  %556 = vmatprep.mubr.msk.f32.mxu0 %vm123_vm0, %v62_v36  ;;  %v206_v41 = vld [vmem:[#allocation5 + $0x10] sm:$0xff]  ;;  %v211_v45 = vld [vmem:[#allocation5 + $0x38] sm:$0xff] }
  0x31   :  { %v638_v42 = vpack.c.bf16 %v207_v39, %v205_v37  ;;  %v640_v43 = vpack.c.bf16 %v206_v41, %v204_v40  ;;  %v209_v44 = vld [vmem:[#allocation5 + $0x28] sm:$0xff]  ;;  %v208_v46 = vld [vmem:[#allocation5 + $0x20] sm:$0xff]  ;;  %v210_v48 = vld [vmem:[#allocation5 + $0x30] sm:$0xff] }
  0x32   :  { %601 = vmatpush1.bf16.msra.mxu0 %v600_v19  ;;  %v642_v47 = vpack.c.bf16 %v211_v45, %v209_v44  ;;  %v213_v49 = vld [vmem:[#allocation5 + $0x48] sm:$0xff]  ;;  %v215_v50 = vld [vmem:[#allocation5 + $0x58] sm:$0xff]  ;;  %v87_v53 = vld [vmem:[#allocation2 + $0xc0] sm:$0xff]  ;;  %v644_v56 = vpack.c.bf16 %v210_v48, %v208_v46 }
  0x33   :  { %603 = vmatprep.subr.bf16.mxu0 %v602_v20  ;;  %639 = vmatprep.subr.bf16.mxu1 %v638_v42  ;;  %v89_v54 = vld [vmem:[#allocation2 + $0xd0] sm:$0xff]  ;;  %v92_v55 = vld [vmem:[#allocation2 + $0xe8] sm:$0xff]  ;;  %v94_v57 = vld [vmem:[#allocation2 + $0xf8] sm:$0xff]  ;;  %v646_v58 = vpack.c.bf16 %v215_v50, %v213_v49 }
  0x34   :  { %641 = vmatpush1.bf16.msra.mxu1 %v640_v43  ;;  %v212_v59 = vld [vmem:[#allocation5 + $0x40] sm:$0xff]  ;;  %v214_v60 = vld [vmem:[#allocation5 + $0x50] sm:$0xff]  ;;  %v217_v61 = vld [vmem:[#allocation5 + $0x68] sm:$0xff]  ;;  %v616_v63 = vpack.c.bf16 %v89_v54, %v87_v53  ;;  %v618_v0 = vpack.c.bf16 %v94_v57, %v92_v55 }
  0x35   :  { %643 = vmatprep.subr.bf16.mxu1 %v642_v47  ;;  %v219_v62 = vld [vmem:[#allocation5 + $0x78] sm:$0xff]  ;;  %v91_v1 = vld [vmem:[#allocation2 + $0xe0] sm:$0xff]  ;;  %v93_v2 = vld [vmem:[#allocation2 + $0xf0] sm:$0xff]  ;;  %v648_v4 = vpack.c.bf16 %v214_v60, %v212_v59 }
  0x36   :  { %605 = vmatpush1.bf16.msra.mxu0 %v604_v25  ;;  %v96_v3 = vld [vmem:[#allocation2 + $0x108] sm:$0xff]  ;;  %v98_v5 = vld [vmem:[#allocation2 + $0x118] sm:$0xff]  ;;  %v650_v6 = vpack.c.bf16 %v219_v62, %v217_v61  ;;  %v216_v7 = vld [vmem:[#allocation5 + $0x60] sm:$0xff]  ;;  %v620_v11 = vpack.c.bf16 %v93_v2, %v91_v1 }
  0x37   :  { %607 = vmatprep.subr.bf16.mxu0 %v606_v26  ;;  %v218_v8 = vld [vmem:[#allocation5 + $0x70] sm:$0xff]  ;;  %v221_v9 = vld [vmem:[#allocation5 + $0x88] sm:$0xff]  ;;  %v223_v10 = vld [vmem:[#allocation5 + $0x98] sm:$0xff]  ;;  %v622_v12 = vpack.c.bf16 %v98_v5, %v96_v3 }
  0x38   :  { %645 = vmatpush1.bf16.msra.mxu1 %v644_v56  ;;  %v95_v13 = vld [vmem:[#allocation2 + $0x100] sm:$0xff]  ;;  %v97_v14 = vld [vmem:[#allocation2 + $0x110] sm:$0xff]  ;;  %v100_v15 = vld [vmem:[#allocation2 + $0x128] sm:$0xff]  ;;  %v652_v16 = vpack.c.bf16 %v218_v8, %v216_v7  ;;  %v654_v18 = vpack.c.bf16 %v223_v10, %v221_v9 }
  0x39   :  { %647 = vmatprep.subr.bf16.mxu1 %v646_v58  ;;  %v102_v17 = vld [vmem:[#allocation2 + $0x138] sm:$0xff]  ;;  %v220_v19 = vld [vmem:[#allocation5 + $0x80] sm:$0xff]  ;;  %v222_v20 = vld [vmem:[#allocation5 + $0x90] sm:$0xff]  ;;  %v624_v23 = vpack.c.bf16 %v97_v14, %v95_v13 }
  0x3a   :  { %609 = vmatpush1.bf16.msra.mxu0 %v608_v33  ;;  %v225_v21 = vld [vmem:[#allocation5 + $0xa8] sm:$0xff]  ;;  %v227_v22 = vld [vmem:[#allocation5 + $0xb8] sm:$0xff]  ;;  %v626_v24 = vpack.c.bf16 %v102_v17, %v100_v15  ;;  %v99_v25 = vld [vmem:[#allocation2 + $0x120] sm:$0xff]  ;;  %v656_v28 = vpack.c.bf16 %v222_v20, %v220_v19 }
  0x3b   :  { %611 = vmatprep.subr.bf16.mxu0 %v610_v38  ;;  %v101_v26 = vld [vmem:[#allocation2 + $0x130] sm:$0xff]  ;;  %v104_v27 = vld [vmem:[#allocation2 + $0x148] sm:$0xff]  ;;  %v106_v29 = vld [vmem:[#allocation2 + $0x158] sm:$0xff]  ;;  %v658_v30 = vpack.c.bf16 %v227_v22, %v225_v21  ;;  %v818_v21 = vmov 0.0|0.0  }
  0x3c   :  { %649 = vmatpush1.bf16.msra.mxu1 %v648_v4  ;;  %v224_v31 = vld [vmem:[#allocation5 + $0xa0] sm:$0xff]  ;;  %v226_v32 = vld [vmem:[#allocation5 + $0xb0] sm:$0xff]  ;;  %v229_v33 = vld [vmem:[#allocation5 + $0xc8] sm:$0xff]  ;;  %v628_v35 = vpack.c.bf16 %v101_v26, %v99_v25  ;;  %v630_v36 = vpack.c.bf16 %v106_v29, %v104_v27 }
  0x3d   :  { %651 = vmatprep.subr.bf16.mxu1 %v650_v6  ;;  %v231_v34 = vld [vmem:[#allocation5 + $0xd8] sm:$0xff]  ;;  %v103_v37 = vld [vmem:[#allocation2 + $0x140] sm:$0xff]  ;;  %v105_v38 = vld [vmem:[#allocation2 + $0x150] sm:$0xff]  ;;  %v660_v40 = vpack.c.bf16 %v226_v32, %v224_v31 }
  0x3e   :  { %613 = vmatpush1.bf16.msra.mxu0 %v612_v51  ;;  %v108_v39 = vld [vmem:[#allocation2 + $0x168] sm:$0xff]  ;;  %v110_v41 = vld [vmem:[#allocation2 + $0x178] sm:$0xff]  ;;  %v662_v42 = vpack.c.bf16 %v231_v34, %v229_v33  ;;  %v228_v43 = vld [vmem:[#allocation5 + $0xc0] sm:$0xff]  ;;  %v632_v47 = vpack.c.bf16 %v105_v38, %v103_v37 }
  0x3f   :  { %615 = vmatprep.subr.bf16.mxu0 %v614_v52  ;;  %v230_v44 = vld [vmem:[#allocation5 + $0xd0] sm:$0xff]  ;;  %v233_v45 = vld [vmem:[#allocation5 + $0xe8] sm:$0xff]  ;;  %v235_v46 = vld [vmem:[#allocation5 + $0xf8] sm:$0xff]  ;;  %v634_v48 = vpack.c.bf16 %v110_v41, %v108_v39 }
  0x40   :  { %653 = vmatpush1.bf16.msra.mxu1 %v652_v16  ;;  %v107_v49 = vld [vmem:[#allocation2 + $0x160] sm:$0xff]  ;;  %v109_v50 = vld [vmem:[#allocation2 + $0x170] sm:$0xff]  ;;  %v664_v51 = vpack.c.bf16 %v230_v44, %v228_v43  ;;  %v666_v52 = vpack.c.bf16 %v235_v46, %v233_v45  ;;  %v237_v55 = vld [vmem:[#allocation5 + $0x108] sm:$0xff] }
  0x41   :  { %655 = vmatprep.subr.bf16.mxu1 %v654_v18  ;;  %v232_v53 = vld [vmem:[#allocation5 + $0xe0] sm:$0xff]  ;;  %v234_v54 = vld [vmem:[#allocation5 + $0xf0] sm:$0xff]  ;;  %v239_v56 = vld [vmem:[#allocation5 + $0x118] sm:$0xff]  ;;  %v636_v57 = vpack.c.bf16 %v109_v50, %v107_v49  ;;  %v113_v49 = vlaneseq }
  0x42   :  { %617 = vmatpush1.bf16.msra.mxu0 %v616_v63  ;;  %v668_v58 = vpack.c.bf16 %v234_v54, %v232_v53  ;;  %v670_v59 = vpack.c.bf16 %v239_v56, %v237_v55  ;;  %v236_v60 = vld [vmem:[#allocation5 + $0x100] sm:$0xff]  ;;  %v238_v61 = vld [vmem:[#allocation5 + $0x110] sm:$0xff]  ;;  %v241_v62 = vld [vmem:[#allocation5 + $0x128] sm:$0xff] }
  0x43   :  { %619 = vmatprep.subr.bf16.mxu0 %v618_v0  ;;  %v243_v63 = vld [vmem:[#allocation5 + $0x138] sm:$0xff]  ;;  %v61_v0 = vld [vmem:[%s1042_s0] sm:$0xff]  ;;  %v672_v1 = vpack.c.bf16 %v238_v61, %v236_v60  ;;  %v242_v4 = vld [vmem:[#allocation5 + $0x130] sm:$0xff]  ;;  %v114_v50 = vshrl.u32 %v113_v49, 7 }
  0x44   :  { %657 = vmatpush1.bf16.msra.mxu1 %v656_v28  ;;  %v674_v2 = vpack.c.bf16 %v243_v63, %v241_v62  ;;  %v240_v3 = vld [vmem:[#allocation5 + $0x120] sm:$0xff]  ;;  %v245_v6 = vld [vmem:[#allocation5 + $0x148] sm:$0xff]  ;;  %v247_v7 = vld [vmem:[#allocation5 + $0x158] sm:$0xff] }
  0x45   :  { %659 = vmatprep.subr.bf16.mxu1 %v658_v30  ;;  %v676_v5 = vpack.c.bf16 %v242_v4, %v240_v3  ;;  %v678_v8 = vpack.c.bf16 %v247_v7, %v245_v6  ;;  %v244_v9 = vld [vmem:[#allocation5 + $0x140] sm:$0xff]  ;;  %v246_v10 = vld [vmem:[#allocation5 + $0x150] sm:$0xff]  ;;  %v251_v13 = vld [vmem:[#allocation5 + $0x178] sm:$0xff]  ;;  %v119_v53 = vsub.s32 1, %v114_v50 }
  0x46   :  { %621 = vmatpush1.bf16.msra.mxu0 %v620_v11  ;;  %v680_v11 = vpack.c.bf16 %v246_v10, %v244_v9  ;;  %v248_v15 = vld [vmem:[#allocation5 + $0x160] sm:$0xff]  ;;  %v250_v16 = vld [vmem:[#allocation5 + $0x170] sm:$0xff]  ;;  %v345_v19 = vld [vmem:[%s1047_s5 + $0x8] sm:$0xff] }
  0x47   :  { %623 = vmatprep.subr.bf16.mxu0 %v622_v12  ;;  %v249_v12 = vld [vmem:[#allocation5 + $0x168] sm:$0xff]  ;;  %v684_v17 = vpack.c.bf16 %v250_v16, %v248_v15  ;;  %v344_v18 = vld [vmem:[%s1047_s5] sm:$0xff]  ;;  %v346_v20 = vld [vmem:[%s1047_s5 + $0x10] sm:$0xff] }
  0x48   :  { %661 = vmatpush1.bf16.msra.mxu1 %v660_v40  ;;  %v682_v14 = vpack.c.bf16 %v251_v13, %v249_v12  ;;  %v687_v22 = vpack.c.bf16 %v345_v19, %v344_v18  ;;  %v348_v25 = vld [vmem:[%s1047_s5 + $0x20] sm:$0xff]  ;;  %v349_v26 = vld [vmem:[%s1047_s5 + $0x28] sm:$0xff]  ;;  %v350_v28 = vld [vmem:[%s1047_s5 + $0x30] sm:$0xff] }
  0x49   :  { %663 = vmatprep.subr.bf16.mxu1 %v662_v42  ;;  %v693_v27 = vpack.c.bf16 %v349_v26, %v348_v25  ;;  %v351_v29 = vld [vmem:[%s1047_s5 + $0x38] sm:$0xff]  ;;  %v352_v31 = vld [vmem:[%s1047_s5 + $0x40] sm:$0xff]  ;;  %v353_v32 = vld [vmem:[%s1047_s5 + $0x48] sm:$0xff] }
  0x4a   :  { %625 = vmatpush1.bf16.msra.mxu0 %v624_v23  ;;  %v347_v23 = vld [vmem:[%s1047_s5 + $0x18] sm:$0xff]  ;;  %v696_v30 = vpack.c.bf16 %v351_v29, %v350_v28  ;;  %v699_v33 = vpack.c.bf16 %v353_v32, %v352_v31  ;;  %v354_v34 = vld [vmem:[%s1047_s5 + $0x50] sm:$0xff]  ;;  %v356_v37 = vld [vmem:[%s1047_s5 + $0x60] sm:$0xff]  ;;  %v820_v29 = vmov 0.0  }
  0x4b   :  { %627 = vmatprep.subr.bf16.mxu0 %v626_v24  ;;  %v690_v24 = vpack.c.bf16 %v347_v23, %v346_v20  ;;  %v357_v38 = vld [vmem:[%s1047_s5 + $0x68] sm:$0xff]  ;;  %v358_v40 = vld [vmem:[%s1047_s5 + $0x70] sm:$0xff]  ;;  %v359_v41 = vld [vmem:[%s1047_s5 + $0x78] sm:$0xff] }
  0x4c   :  { %665 = vmatpush1.bf16.msra.mxu1 %v664_v51  ;;  %v705_v39 = vpack.c.bf16 %v357_v38, %v356_v37  ;;  %v708_v42 = vpack.c.bf16 %v359_v41, %v358_v40  ;;  %v360_v43 = vld [vmem:[%s1047_s5 + $0x80] sm:$0xff]  ;;  %v361_v44 = vld [vmem:[%s1047_s5 + $0x88] sm:$0xff]  ;;  %v362_v46 = vld [vmem:[%s1047_s5 + $0x90] sm:$0xff]  ;;  %v115_v51 = vsub.s32 0, %v114_v50 }
  0x4d   :  { %667 = vmatprep.subr.bf16.mxu1 %v666_v52  ;;  %v711_v45 = vpack.c.bf16 %v361_v44, %v360_v43  ;;  %v111_v52 = vld [vmem:[%s1044_s2] sm:$0x3]  ;;  %v366_v3 = vld [vmem:[%s1047_s5 + $0xb0] sm:$0xff]  ;;  %v367_v4 = vld [vmem:[%s1047_s5 + $0xb8] sm:$0xff] }
  0x4e   :  { %629 = vmatpush1.bf16.msra.mxu0 %v628_v35  ;;  %v355_v35 = vld [vmem:[%s1047_s5 + $0x58] sm:$0xff]  ;;  %v116_v54 = vrot.slane %v111_v52, %v115_v51  ;;  %v120_v55 = vrot.slane %v111_v52, %v119_v53  ;;  %v451_v6 = vld [vmem:[%s1049_s7] sm:$0xff]  ;;  %v452_v7 = vld [vmem:[%s1049_s7 + $0x8] sm:$0xff] }
  0x4f   :  { %631 = vmatprep.subr.bf16.mxu0 %v630_v36  ;;  %v702_v36 = vpack.c.bf16 %v355_v35, %v354_v34  ;;  %v723_v9 = vpack.c.bf16 %v452_v7, %v451_v6  ;;  %v454_v10 = vld [vmem:[%s1049_s7 + $0x18] sm:$0xff]  ;;  %v455_v12 = vld [vmem:[%s1049_s7 + $0x20] sm:$0xff]  ;;  %v456_v13 = vld [vmem:[%s1049_s7 + $0x28] sm:$0xff] }
  0x50   :  { %669 = vmatpush1.bf16.msra.mxu1 %v668_v58  ;;  %v252_v15 = vld [vmem:[%s1046_s4] sm:$0x3] }
  0x51   :  { %671 = vmatprep.subr.bf16.mxu1 %v670_v59  ;;  %v257_v16 = vrot.slane %v252_v15, %v115_v51 }
  0x52   :  { %633 = vmatpush1.bf16.msra.mxu0 %v632_v47  ;;  %v363_v47 = vld [vmem:[%s1047_s5 + $0x98] sm:$0xff] }
  0x53   :  { %635 = vmatprep.subr.bf16.mxu0 %v634_v48  ;;  %v714_v48 = vpack.c.bf16 %v363_v47, %v362_v46 }
  0x54   :  { %673 = vmatpush1.bf16.msra.mxu1 %v672_v1  ;;  %v365_v1 = vld [vmem:[%s1047_s5 + $0xa8] sm:$0xff] }
  0x55   :  { %675 = vmatprep.subr.bf16.mxu1 %v674_v2 }
  0x56   :  { %637 = vmatpush1.bf16.msra.mxu0 %v636_v57 }
  0x57   :  { %686 = vmatprep.subr.bf16.mxu0 %v818_v21 }
  0x58   :  { %677 = vmatpush1.bf16.msra.mxu1 %v676_v5  ;;  %v720_v5 = vpack.c.bf16 %v367_v4, %v366_v3 }
  0x59   :  { %192 = vmatmul.mubr.f32.vlgmr.msra.gmra.mrb[0].mxu0 %v61_v0  ;;  %679 = vmatprep.subr.bf16.mxu1 %v678_v8  ;;  %v364_v0 = vld [vmem:[%s1047_s5 + $0xa0] sm:$0xff]  ;;  %v453_v8 = vld [vmem:[%s1049_s7 + $0x10] sm:$0xff] }
  0x5a   :  { %688 = vmatpush1.bf16.msra.mxu0 %v687_v22  ;;  %v717_v2 = vpack.c.bf16 %v365_v1, %v364_v0 }
  0x5b   :  { %689 = vmatprep.subr.bf16.mxu0 %v818_v21 }
  0x5c   :  { %681 = vmatpush1.bf16.msra.mxu1 %v680_v11  ;;  %v726_v11 = vpack.c.bf16 %v454_v10, %v453_v8 }
  0x5d   :  { %683 = vmatprep.subr.bf16.mxu1 %v682_v14  ;;  %v729_v14 = vpack.c.bf16 %v456_v13, %v455_v12 }
  0x5e   :  { %691 = vmatpush1.bf16.msra.mxu0 %v690_v24 }
  0x5f   :  { %692 = vmatprep.subr.bf16.mxu0 %v818_v21 }
  0x60   :  { %685 = vmatpush1.bf16.msra.mxu1 %v684_v17  ;;  %v261_v17 = vrot.slane %v252_v15, %v119_v53 }
  0x61   :  { %722 = vmatprep.subr.bf16.mxu1 %v818_v21 }
  0x62   :  { %694 = vmatpush1.bf16.msra.mxu0 %v693_v27  ;;  %v458_v27 = vld [vmem:[%s1049_s7 + $0x38] sm:$0xff] }
  0x63   :  { %695 = vmatprep.subr.bf16.mxu0 %v818_v21 }
  0x66   :  { %697 = vmatpush1.bf16.msra.mxu0 %v696_v30  ;;  %v558_v30 = vld [vmem:[%s1048_s6] ss:$0 sm:$0xff] }
  0x67   :  { %698 = vmatprep.subr.bf16.mxu0 %v818_v21 }
  0x6a   :  { %700 = vmatpush1.bf16.msra.mxu0 %v699_v33 }
  0x6b   :  { %701 = vmatprep.subr.bf16.mxu0 %v818_v21 }
  0x6e   :  { %703 = vmatpush1.bf16.msra.mxu0 %v702_v36  ;;  %v560_v36 = vld [vmem:[%s1050_s8] ss:$0 sm:$0xff] }
  0x6f   :  { %704 = vmatprep.subr.bf16.mxu0 %v818_v21 }
  0x72   :  { %706 = vmatpush1.bf16.msra.mxu0 %v705_v39 }
  0x73   :  { %707 = vmatprep.subr.bf16.mxu0 %v818_v21 }
  0x76   :  { %709 = vmatpush1.bf16.msra.mxu0 %v708_v42 }
  0x77   :  { %710 = vmatprep.subr.bf16.mxu0 %v818_v21 }
  0x7a   :  { %712 = vmatpush1.bf16.msra.mxu0 %v711_v45 }
  0x7b   :  { %713 = vmatprep.subr.bf16.mxu0 %v818_v21 }
  0x7e   :  { %715 = vmatpush1.bf16.msra.mxu0 %v714_v48 }
  0x7f   :  { %716 = vmatprep.subr.bf16.mxu0 %v818_v21 }
  0x82   :  { %718 = vmatpush1.bf16.msra.mxu0 %v717_v2 }
  0x83   :  { %719 = vmatprep.subr.bf16.mxu0 %v818_v21 }
  0x86   :  { %721 = vmatpush1.bf16.msra.mxu0 %v720_v5 }
 0x12c   :  { %v193_v56 = vpop.f32.mrb[0].mxu0 }
 0x12d   :  { %v194_v57 = vadd.f32 %v193_v56, %v116_v54  ;;  %v195_v58 = vpop.f32.mrb[1].mxu0 }
 0x12e   :  { %v196_v59 = vadd.f32 %v195_v58, %v120_v55 }
 0x12f   :  { %v200_v60 = vmul.f32 0.01, %v194_v57  ;;  %vm198_vm2 = vcmp.ge.f32.partialorder %v194_v57, 0.0 }
 0x130   :  { %vm199_vm1 = vcmp.ge.f32.partialorder %v196_v59, 0.0  ;;  %v201_v61 = vmul.f32 0.01, %v196_v59 }
 0x131   :  { %v202_v63 = vsel %vm198_vm2, %v194_v57, %v200_v60 }
 0x132   :  { %v203_v62 = vsel %vm199_vm1, %v196_v59, %v201_v61 }
 0x133   :  { %557 = vmatprep.mubr.msk.f32.mxu1 %vm123_vm0, %v203_v62 }
 0x134   :  { %332 = vmatmul.mubr.f32.vlgmr.msra.gmra.mrb[0].mxu1 %v202_v63 }
 0x135   :  { %724 = vmatpush3.bf16.msra.mxu1 %v723_v9  ;;  %587 = vmatprep.mubr.msk.f32.mxu1 %vm819_vm5, %v820_v29 }
 0x136   :  { %725 = vmatprep.subr.bf16.mxu1 %v818_v21 }
 0x139   :  { %727 = vmatpush3.bf16.msra.mxu1 %v726_v11 }
 0x13a   :  { %728 = vmatprep.subr.bf16.mxu1 %v818_v21 }
 0x13d   :  { %730 = vmatpush3.bf16.msra.mxu1 %v729_v14 }
 0x13e   :  { %731 = vmatprep.subr.bf16.mxu1 %v818_v21  ;;  %v457_v21 = vld [vmem:[%s1049_s7 + $0x30] sm:$0xff]  ;;  %s821_s7 = smov [#allocation7]  }
 0x13f   :  { %v732_v28 = vpack.c.bf16 %v458_v27, %v457_v21  ;;  %s546_s3 = sshll.u32 %s821_s7, 4  ;;  %s547_s3 = int_to_ptr.vmem [resolvable:$true] %s546_s3 }
 0x140   :  { %s786_s6 = scalar_lea.vmem %s547_s3, 128  ;;  %p791_p3 = scmp.lt.s32.totalorder %s547_s3, %s547_s3 }
 0x141   :  { %733 = vmatpush3.bf16.msra.mxu1 %v732_v28  ;;  %p787_p2 = scmp.ne.s32.totalorder %s547_s3, %s786_s6  ;;  %p792_p4 = scmp.lt.s32.totalorder %s786_s6, %s786_s6 }
 0x143   :  { %p793_p5 = por %p792_p4, %p791_p3 }
 0x145   :  { %p794_p6 = pnand %p793_p5, %p787_p2 }
 0x207   :  { %v333_v18 = vpop.f32.mrb[0].mxu1 }
 0x208   :  { %v334_v19 = vadd.f32 %v333_v18, %v257_v16  ;;  %v335_v20 = vpop.f32.mrb[1].mxu1 }
 0x209   :  { %v336_v22 = vadd.f32 %v335_v20, %v261_v17 }
 0x20a   :  { %v340_v23 = vmul.f32 0.01, %v334_v19  ;;  %vm338_vm3 = vcmp.ge.f32.partialorder %v334_v19, 0.0 }
 0x20b   :  { %vm339_vm4 = vcmp.ge.f32.partialorder %v336_v22, 0.0  ;;  %v341_v24 = vmul.f32 0.01, %v336_v22 }
 0x20c   :  { %v342_v26 = vsel %vm338_vm3, %v334_v19, %v340_v23 }
 0x20d   :  { %v343_v25 = vsel %vm339_vm4, %v336_v22, %v341_v24 }
 0x20e   :  { %559 = vmatprep.mubr.msk.f32.mxu0 %vm123_vm0, %v343_v25 }
 0x20f   :  { %443 = vmatmul.mubr.f32.vlgmr.msra.gmra.mrb[2].mxu0 %v342_v26 }
 0x2e2   :  { %v444_v31 = vpop.f32.mrb[2].mxu0 }
 0x2e3   :  { %v445_v32 = vadd.f32 %v558_v30, %v444_v31  ;;  %v446_v33 = vpop.f32.mrb[3].mxu0 }
 0x2e5   :  { %vm448_vm6 = vcmp.ge.f32.partialorder %v445_v32, 0.0  ;;  %v449_v34 = vmul.f32 0.01, %v445_v32 }
 0x2e7   :  { %v450_v35 = vsel %vm448_vm6, %v445_v32, %v449_v34 }
 0x2e8   :  { %588 = vmatmul.mubr.msk.f32.vlgmr.msra.gmra.mrb[2].mxu1 %vm123_vm0, %v450_v35 }
 0x3bb   :  { %v535_v37 = vpop.f32.mrb[2].mxu1 }
 0x3bc   :  { %v536_v38 = vadd.f32 %v560_v36, %v535_v37  ;;  %v589_v39 = vpop.f32.mrb[3].mxu1 }
 0x3be   :  { %539 = vst [vmem:[#allocation7] sm:$0xff] %v536_v38 }
 0x3bf   :  { %797 = shalt.err (!%p794_p6)
}
 0x3c0   :  { %s798_s15 = scalar_lea.hbm %s1051_s9, 128 }
 0x3c1   :  { %p799_p7 = scmp.ne.s32.totalorder %s1051_s9, %s798_s15  ;;  %p802_p8 = scmp.lt.u32.totalorder %s798_s15, %s1051_s9 }
 0x3c3   :  { %p804_p9 = pnand %p802_p8, %p799_p7 }
 0x3c5   :  { %807 = shalt.err (!%p804_p9)
}
 0x3c6   :  { %549 = dma.vmem_to_hbm [thread:$0]  %s547_s3, 128, %s1051_s9, [#allocation4]  }
 0x3c7   :  { %812 = dma.done.wait [#allocation4], 128  }
 0x3c8   :  { %813 = vsyncadd [#allocation4], 4294967168 }
 0x3c9   :  { %553 = vsyncpa [#allocation3], 1 }
 0x3ca   :  { %554 = vsyncpa [#allocation6], 1 }
 0x3cb   :  { %555 = vsyncpa [#allocation4], 1 }

</bundles_post_ra>
